<compile_context>
chip_gen: v7x
topology: tpu7x:2x2x1
jax: 0.10.0
libtpu: 0.0.40
codegen_flags: <defaults>
</compile_context>

<pallas_src>
import functools

import numpy as np
import jax
import jax.numpy as jnp
from jax.experimental import pallas as pl
from jax.experimental.pallas import tpu as pltpu


WIN_SIZE = 11
WIN_SIGMA = 1.5
K1 = 0.01
K2 = 0.03


def _gaussian_1d(size: int, sigma: float) -> np.ndarray:
    coords = np.arange(size, dtype=np.float64) - size // 2
    g = np.exp(-(coords ** 2) / (2.0 * sigma ** 2))
    g = g / g.sum()
    return g.astype(np.float32)


def _filter_matrices(H: int, W: int):
    """Valid-conv gaussian filter matrices Fh (Ho,H) and Fw (W,Wo)."""
    g = _gaussian_1d(WIN_SIZE, WIN_SIGMA)
    Ho = H - WIN_SIZE + 1
    Wo = W - WIN_SIZE + 1
    fh = np.zeros((Ho, H), np.float32)
    for i in range(Ho):
        fh[i, i:i + WIN_SIZE] = g
    fw = np.zeros((W, Wo), np.float32)
    for j in range(Wo):
        fw[j:j + WIN_SIZE, j] = g
    return jnp.asarray(fh), jnp.asarray(fw)


def _vmem_config():
    """(block-choice budget, vmem_limit_bytes), generation-aware, safe fallback."""
    try:
        cap = int(pltpu.get_tpu_info().vmem_capacity_bytes)
    except Exception:
        cap = 64 * 1024 * 1024          # assume the smallest (v7x per-core) if unknown
    if cap >= 100 * 1024 * 1024:        # v5e / v6e: 128 MiB VMEM
        return 24 * 1024 * 1024, 64 * 1024 * 1024
    return 10 * 1024 * 1024, 32 * 1024 * 1024   # v7x-class: 64 MiB per core


def _choose_block(nc: int, H: int, W: int, Ho: int, Wo: int, budget: int) -> int:
    """How many (n,c) slices to process per grid step, from a VMEM budget."""
    fixed = 4 * (Ho * H + W * Wo)            # Fh + Fw resident in VMEM
    per_slice = 4 * (
        2 * 2 * H * W                        # x, y input blocks (double-buffered)
        + 3 * H * W                          # x*x, y*y, x*y temporaries
        + 5 * H * Wo                         # row(W)-filtered maps
        + 8 * Ho * Wo)                       # fully-filtered maps + SSIM temps
    b = max(1, (budget - fixed) // per_slice)
    b = min(b, nc)
    b = min(b, 16)                           # bound unrolled kernel size / compile time
    b = min(b, max(1, (nc + 1) // 2))        # keep num_blocks >= 2 (v7x megacore)
    return int(b)


def _ssim_block_kernel(x_ref, y_ref, fh_ref, fw_ref, out_ref, *,
                       b: int, nc: int, ho: int, wo: int, c1: float, c2: float):
    """One grid step: sum of per-slice SSIM means for B (n,c) slices -> (1,1,1)."""
    fh = fh_ref[...]                 # (Ho, H)  f32
    fw = fw_ref[...]                 # (W, Wo)  f32
    base = pl.program_id(0) * b
    need_mask = (nc % b) != 0        # only the last block can hold padded slices

    def gfilter(a):                  # separable gaussian: both passes on the MXU
        t = jnp.dot(a, fw, preferred_element_type=jnp.float32)      # (H, Wo)
        return jnp.dot(fh, t, preferred_element_type=jnp.float32)   # (Ho, Wo)

    acc = None
    for s in range(b):               # static unroll over the B slices of this block
        x = x_ref[s]                 # (H, W) f32 — static major-dim index (free view)
        y = y_ref[s]

        mu1 = gfilter(x)
        mu2 = gfilter(y)
        ex2 = gfilter(x * x)
        ey2 = gfilter(y * y)
        exy = gfilter(x * y)

        mu1_sq = mu1 * mu1
        mu2_sq = mu2 * mu2
        mu1_mu2 = mu1 * mu2
        sigma1_sq = ex2 - mu1_sq
        sigma2_sq = ey2 - mu2_sq
        sigma12 = exy - mu1_mu2

        num = (2.0 * mu1_mu2 + c1) * (2.0 * sigma12 + c2)
        den = (mu1_sq + mu2_sq + c1) * (sigma1_sq + sigma2_sq + c2)
        # Exact reciprocal (approx=True would risk the 1e-4/1e-5 self-test tol).
        ssim_map = num * pl.reciprocal(den, approx=False)            # (Ho, Wo)

        if need_mask:
            valid = ((base + s) < nc).astype(jnp.float32)            # scalar 0/1
            ssim_map = ssim_map * valid

        acc = ssim_map if acc is None else acc + ssim_map

    inv_npix = jnp.float32(1.0 / (ho * wo))
    block_sum = jnp.sum(acc, keepdims=True) * inv_npix               # (1, 1)
    out_ref[...] = block_sum.reshape(1, 1, 1)


def ssim_loss(x: jax.Array, y: jax.Array, data_range: float = 1.0) -> jax.Array:
    """x, y: (N, C, H, W) float32 (NCHW).  Returns scalar 1 - SSIM."""
    N, C, H, W = x.shape
    assert y.shape == x.shape
    assert H >= WIN_SIZE and W >= WIN_SIZE, "spatial dims must be >= win_size (11)"

    Ho = H - WIN_SIZE + 1
    Wo = W - WIN_SIZE + 1
    fh, fw = _filter_matrices(H, W)

    nc = N * C
    budget, vmem_limit = _vmem_config()
    B = _choose_block(nc, H, W, Ho, Wo, budget)
    num_blocks = -(-nc // B)
    nc_pad = num_blocks * B

    x2 = x.reshape(nc, H, W).astype(jnp.float32)
    y2 = y.reshape(nc, H, W).astype(jnp.float32)
    if nc_pad != nc:
        pad = ((0, nc_pad - nc), (0, 0), (0, 0))
        x2 = jnp.pad(x2, pad)       # padded slices are masked out inside the kernel
        y2 = jnp.pad(y2, pad)

    kernel = functools.partial(
        _ssim_block_kernel, b=B, nc=nc, ho=Ho, wo=Wo,
        c1=float((K1 * data_range) ** 2),
        c2=float((K2 * data_range) ** 2))

    block_sums = pl.pallas_call(
        kernel,
        out_shape=jax.ShapeDtypeStruct((num_blocks, 1, 1), jnp.float32),
        grid_spec=pltpu.PrefetchScalarGridSpec(
            num_scalar_prefetch=0,
            grid=(num_blocks,),
            in_specs=[
                pl.BlockSpec((B, H, W), lambda i: (i, 0, 0)),
                pl.BlockSpec((B, H, W), lambda i: (i, 0, 0)),
                pl.BlockSpec((Ho, H), lambda i: (0, 0)),   # Fh: resident, fetched once
                pl.BlockSpec((W, Wo), lambda i: (0, 0)),   # Fw: resident, fetched once
            ],
            out_specs=pl.BlockSpec((1, 1, 1), lambda i: (i, 0, 0)),
        ),
        compiler_params=pltpu.CompilerParams(
            dimension_semantics=("parallel",),
            vmem_limit_bytes=vmem_limit),
    )(x2, y2, fh, fw)

    return 1.0 - jnp.sum(block_sums) / nc


def _ssim_loss_ref(x, y, data_range=1.0):
    """Pure-JAX reference (dense Fh/Fw einsum) for sanity checking."""
    N, C, H, W = x.shape
    fh, fw = _filter_matrices(H, W)
    x = x.reshape(N * C, H, W).astype(jnp.float32)
    y = y.reshape(N * C, H, W).astype(jnp.float32)

    def filt(a):
        return jnp.einsum("oh,bhw,wp->bop", fh, a, fw)

    c1 = (K1 * data_range) ** 2
    c2 = (K2 * data_range) ** 2
    mu1, mu2 = filt(x), filt(y)
    s1 = filt(x * x) - mu1 * mu1
    s2 = filt(y * y) - mu2 * mu2
    s12 = filt(x * y) - mu1 * mu2
    cs = (2 * s12 + c2) / (s1 + s2 + c2)
    ssim_map = ((2 * mu1 * mu2 + c1) / (mu1 * mu1 + mu2 * mu2 + c1)) * cs
    return 1.0 - jnp.mean(ssim_map)


if __name__ == "__main__":
    key = jax.random.PRNGKey(0)
    kx, ky = jax.random.split(key)
    N, C, H, W = 2, 4, 16, 16
    x = jax.random.uniform(kx, (N, C, H, W), dtype=jnp.float32)
    y = jnp.clip(x + 0.05 * jax.random.normal(ky, (N, C, H, W), dtype=jnp.float32),
                 0.0, 1.0)

    loss = ssim_loss(x, y, data_range=1.0)
    loss = jax.block_until_ready(loss)

    ref = _ssim_loss_ref(x, y, data_range=1.0)
    np.testing.assert_allclose(np.asarray(loss), np.asarray(ref),
                               rtol=1e-4, atol=1e-5)
    print("KERNEL_OK")
</pallas_src>

<mosaic_0001>
module attributes {stable_mosaic.version = 11 : i64} {
  func.func @_ssim_block_kernel(%arg0: i32, %arg1: memref<4x16x16xf32, #tpu.memory_space<vmem>>, %arg2: memref<4x16x16xf32, #tpu.memory_space<vmem>>, %arg3: memref<6x16xf32, #tpu.memory_space<vmem>>, %arg4: memref<16x6xf32, #tpu.memory_space<vmem>>, %arg5: memref<1x1x1xf32, #tpu.memory_space<vmem>>) attributes {dimension_semantics = [#tpu.dimension_semantics<parallel>], iteration_bounds = array<i64: 2>, scalar_prefetch = 0 : i64, scratch_operands = 0 : i64, tpu.core_type = #tpu.core_type<tc>, window_params = [{transform_indices = @transform_0, window_bounds = array<i64: 4, 16, 16>}, {transform_indices = @transform_1, window_bounds = array<i64: 4, 16, 16>}, {pipeline_mode = #tpu.pipeline_mode<synchronous>, transform_indices = @transform_2, window_bounds = array<i64: 6, 16>}, {pipeline_mode = #tpu.pipeline_mode<synchronous>, transform_indices = @transform_3, window_bounds = array<i64: 16, 6>}, {transform_indices = @transform_4, window_bounds = array<i64: 1, 1, 1>}]} {
    %c0 = arith.constant 0 : index
    %c0_0 = arith.constant 0 : index
    %0 = vector.load %arg3[%c0, %c0_0] : memref<6x16xf32, #tpu.memory_space<vmem>>, vector<6x16xf32>
    %c0_1 = arith.constant 0 : index
    %c0_2 = arith.constant 0 : index
    %1 = vector.load %arg4[%c0_1, %c0_2] : memref<16x6xf32, #tpu.memory_space<vmem>>, vector<16x6xf32>
    %c0_3 = arith.constant 0 : index
    %c0_4 = arith.constant 0 : index
    %c0_5 = arith.constant 0 : index
    %2 = vector.load %arg1[%c0_3, %c0_4, %c0_5] : memref<4x16x16xf32, #tpu.memory_space<vmem>>, vector<1x16x16xf32>
    %3 = vector.shape_cast %2 : vector<1x16x16xf32> to vector<16x16xf32>
    %c0_6 = arith.constant 0 : index
    %c0_7 = arith.constant 0 : index
    %c0_8 = arith.constant 0 : index
    %4 = vector.load %arg2[%c0_6, %c0_7, %c0_8] : memref<4x16x16xf32, #tpu.memory_space<vmem>>, vector<1x16x16xf32>
    %5 = vector.shape_cast %4 : vector<1x16x16xf32> to vector<16x16xf32>
    %cst = arith.constant dense<0.000000e+00> : vector<16x6xf32>
    %6 = tpu.matmul %3, %1, %cst {dimension_numbers = #tpu.dot_dimension_numbers<[1], [0], [0], [1], [0, 0, 1, 1], [], []>} : vector<16x16xf32>, vector<16x6xf32>, vector<16x6xf32> -> vector<16x6xf32>
    %cst_9 = arith.constant dense<0.000000e+00> : vector<6x6xf32>
    %7 = tpu.matmul %0, %6, %cst_9 {dimension_numbers = #tpu.dot_dimension_numbers<[1], [0], [0], [1], [0, 0, 1, 1], [], []>} : vector<6x16xf32>, vector<16x6xf32>, vector<6x6xf32> -> vector<6x6xf32>
    %cst_10 = arith.constant dense<0.000000e+00> : vector<16x6xf32>
    %8 = tpu.matmul %5, %1, %cst_10 {dimension_numbers = #tpu.dot_dimension_numbers<[1], [0], [0], [1], [0, 0, 1, 1], [], []>} : vector<16x16xf32>, vector<16x6xf32>, vector<16x6xf32> -> vector<16x6xf32>
    %cst_11 = arith.constant dense<0.000000e+00> : vector<6x6xf32>
    %9 = tpu.matmul %0, %8, %cst_11 {dimension_numbers = #tpu.dot_dimension_numbers<[1], [0], [0], [1], [0, 0, 1, 1], [], []>} : vector<6x16xf32>, vector<16x6xf32>, vector<6x6xf32> -> vector<6x6xf32>
    %10 = arith.mulf %3, %3 : vector<16x16xf32>
    %cst_12 = arith.constant dense<0.000000e+00> : vector<16x6xf32>
    %11 = tpu.matmul %10, %1, %cst_12 {dimension_numbers = #tpu.dot_dimension_numbers<[1], [0], [0], [1], [0, 0, 1, 1], [], []>} : vector<16x16xf32>, vector<16x6xf32>, vector<16x6xf32> -> vector<16x6xf32>
    %cst_13 = arith.constant dense<0.000000e+00> : vector<6x6xf32>
    %12 = tpu.matmul %0, %11, %cst_13 {dimension_numbers = #tpu.dot_dimension_numbers<[1], [0], [0], [1], [0, 0, 1, 1], [], []>} : vector<6x16xf32>, vector<16x6xf32>, vector<6x6xf32> -> vector<6x6xf32>
    %13 = arith.mulf %5, %5 : vector<16x16xf32>
    %cst_14 = arith.constant dense<0.000000e+00> : vector<16x6xf32>
    %14 = tpu.matmul %13, %1, %cst_14 {dimension_numbers = #tpu.dot_dimension_numbers<[1], [0], [0], [1], [0, 0, 1, 1], [], []>} : vector<16x16xf32>, vector<16x6xf32>, vector<16x6xf32> -> vector<16x6xf32>
    %cst_15 = arith.constant dense<0.000000e+00> : vector<6x6xf32>
    %15 = tpu.matmul %0, %14, %cst_15 {dimension_numbers = #tpu.dot_dimension_numbers<[1], [0], [0], [1], [0, 0, 1, 1], [], []>} : vector<6x16xf32>, vector<16x6xf32>, vector<6x6xf32> -> vector<6x6xf32>
    %16 = arith.mulf %3, %5 : vector<16x16xf32>
    %cst_16 = arith.constant dense<0.000000e+00> : vector<16x6xf32>
    %17 = tpu.matmul %16, %1, %cst_16 {dimension_numbers = #tpu.dot_dimension_numbers<[1], [0], [0], [1], [0, 0, 1, 1], [], []>} : vector<16x16xf32>, vector<16x6xf32>, vector<16x6xf32> -> vector<16x6xf32>
    %cst_17 = arith.constant dense<0.000000e+00> : vector<6x6xf32>
    %18 = tpu.matmul %0, %17, %cst_17 {dimension_numbers = #tpu.dot_dimension_numbers<[1], [0], [0], [1], [0, 0, 1, 1], [], []>} : vector<6x16xf32>, vector<16x6xf32>, vector<6x6xf32> -> vector<6x6xf32>
    %19 = arith.mulf %7, %7 : vector<6x6xf32>
    %20 = arith.mulf %9, %9 : vector<6x6xf32>
    %21 = arith.mulf %7, %9 : vector<6x6xf32>
    %22 = arith.subf %12, %19 : vector<6x6xf32>
    %23 = arith.subf %15, %20 : vector<6x6xf32>
    %24 = arith.subf %18, %21 : vector<6x6xf32>
    %cst_18 = arith.constant 2.000000e+00 : f32
    %25 = vector.broadcast %cst_18 : f32 to vector<6x6xf32>
    %26 = arith.mulf %25, %21 : vector<6x6xf32>
    %cst_19 = arith.constant 9.99999974E-5 : f32
    %27 = vector.broadcast %cst_19 : f32 to vector<6x6xf32>
    %28 = arith.addf %26, %27 : vector<6x6xf32>
    %cst_20 = arith.constant 2.000000e+00 : f32
    %29 = vector.broadcast %cst_20 : f32 to vector<6x6xf32>
    %30 = arith.mulf %29, %24 : vector<6x6xf32>
    %cst_21 = arith.constant 8.99999984E-4 : f32
    %31 = vector.broadcast %cst_21 : f32 to vector<6x6xf32>
    %32 = arith.addf %30, %31 : vector<6x6xf32>
    %33 = arith.mulf %28, %32 : vector<6x6xf32>
    %34 = arith.addf %19, %20 : vector<6x6xf32>
    %cst_22 = arith.constant 9.99999974E-5 : f32
    %35 = vector.broadcast %cst_22 : f32 to vector<6x6xf32>
    %36 = arith.addf %34, %35 : vector<6x6xf32>
    %37 = arith.addf %22, %23 : vector<6x6xf32>
    %cst_23 = arith.constant 8.99999984E-4 : f32
    %38 = vector.broadcast %cst_23 : f32 to vector<6x6xf32>
    %39 = arith.addf %37, %38 : vector<6x6xf32>
    %40 = arith.mulf %36, %39 : vector<6x6xf32>
    %41 = tpu.reciprocal %40 : vector<6x6xf32> -> vector<6x6xf32>
    %42 = arith.mulf %33, %41 : vector<6x6xf32>
    %c1 = arith.constant 1 : index
    %c0_24 = arith.constant 0 : index
    %c0_25 = arith.constant 0 : index
    %43 = vector.load %arg1[%c1, %c0_24, %c0_25] : memref<4x16x16xf32, #tpu.memory_space<vmem>>, vector<1x16x16xf32>
    %44 = vector.shape_cast %43 : vector<1x16x16xf32> to vector<16x16xf32>
    %c1_26 = arith.constant 1 : index
    %c0_27 = arith.constant 0 : index
    %c0_28 = arith.constant 0 : index
    %45 = vector.load %arg2[%c1_26, %c0_27, %c0_28] : memref<4x16x16xf32, #tpu.memory_space<vmem>>, vector<1x16x16xf32>
    %46 = vector.shape_cast %45 : vector<1x16x16xf32> to vector<16x16xf32>
    %cst_29 = arith.constant dense<0.000000e+00> : vector<16x6xf32>
    %47 = tpu.matmul %44, %1, %cst_29 {dimension_numbers = #tpu.dot_dimension_numbers<[1], [0], [0], [1], [0, 0, 1, 1], [], []>} : vector<16x16xf32>, vector<16x6xf32>, vector<16x6xf32> -> vector<16x6xf32>
    %cst_30 = arith.constant dense<0.000000e+00> : vector<6x6xf32>
    %48 = tpu.matmul %0, %47, %cst_30 {dimension_numbers = #tpu.dot_dimension_numbers<[1], [0], [0], [1], [0, 0, 1, 1], [], []>} : vector<6x16xf32>, vector<16x6xf32>, vector<6x6xf32> -> vector<6x6xf32>
    %cst_31 = arith.constant dense<0.000000e+00> : vector<16x6xf32>
    %49 = tpu.matmul %46, %1, %cst_31 {dimension_numbers = #tpu.dot_dimension_numbers<[1], [0], [0], [1], [0, 0, 1, 1], [], []>} : vector<16x16xf32>, vector<16x6xf32>, vector<16x6xf32> -> vector<16x6xf32>
    %cst_32 = arith.constant dense<0.000000e+00> : vector<6x6xf32>
    %50 = tpu.matmul %0, %49, %cst_32 {dimension_numbers = #tpu.dot_dimension_numbers<[1], [0], [0], [1], [0, 0, 1, 1], [], []>} : vector<6x16xf32>, vector<16x6xf32>, vector<6x6xf32> -> vector<6x6xf32>
    %51 = arith.mulf %44, %44 : vector<16x16xf32>
    %cst_33 = arith.constant dense<0.000000e+00> : vector<16x6xf32>
    %52 = tpu.matmul %51, %1, %cst_33 {dimension_numbers = #tpu.dot_dimension_numbers<[1], [0], [0], [1], [0, 0, 1, 1], [], []>} : vector<16x16xf32>, vector<16x6xf32>, vector<16x6xf32> -> vector<16x6xf32>
    %cst_34 = arith.constant dense<0.000000e+00> : vector<6x6xf32>
    %53 = tpu.matmul %0, %52, %cst_34 {dimension_numbers = #tpu.dot_dimension_numbers<[1], [0], [0], [1], [0, 0, 1, 1], [], []>} : vector<6x16xf32>, vector<16x6xf32>, vector<6x6xf32> -> vector<6x6xf32>
    %54 = arith.mulf %46, %46 : vector<16x16xf32>
    %cst_35 = arith.constant dense<0.000000e+00> : vector<16x6xf32>
    %55 = tpu.matmul %54, %1, %cst_35 {dimension_numbers = #tpu.dot_dimension_numbers<[1], [0], [0], [1], [0, 0, 1, 1], [], []>} : vector<16x16xf32>, vector<16x6xf32>, vector<16x6xf32> -> vector<16x6xf32>
    %cst_36 = arith.constant dense<0.000000e+00> : vector<6x6xf32>
    %56 = tpu.matmul %0, %55, %cst_36 {dimension_numbers = #tpu.dot_dimension_numbers<[1], [0], [0], [1], [0, 0, 1, 1], [], []>} : vector<6x16xf32>, vector<16x6xf32>, vector<6x6xf32> -> vector<6x6xf32>
    %57 = arith.mulf %44, %46 : vector<16x16xf32>
    %cst_37 = arith.constant dense<0.000000e+00> : vector<16x6xf32>
    %58 = tpu.matmul %57, %1, %cst_37 {dimension_numbers = #tpu.dot_dimension_numbers<[1], [0], [0], [1], [0, 0, 1, 1], [], []>} : vector<16x16xf32>, vector<16x6xf32>, vector<16x6xf32> -> vector<16x6xf32>
    %cst_38 = arith.constant dense<0.000000e+00> : vector<6x6xf32>
    %59 = tpu.matmul %0, %58, %cst_38 {dimension_numbers = #tpu.dot_dimension_numbers<[1], [0], [0], [1], [0, 0, 1, 1], [], []>} : vector<6x16xf32>, vector<16x6xf32>, vector<6x6xf32> -> vector<6x6xf32>
    %60 = arith.mulf %48, %48 : vector<6x6xf32>
    %61 = arith.mulf %50, %50 : vector<6x6xf32>
    %62 = arith.mulf %48, %50 : vector<6x6xf32>
    %63 = arith.subf %53, %60 : vector<6x6xf32>
    %64 = arith.subf %56, %61 : vector<6x6xf32>
    %65 = arith.subf %59, %62 : vector<6x6xf32>
    %cst_39 = arith.constant 2.000000e+00 : f32
    %66 = vector.broadcast %cst_39 : f32 to vector<6x6xf32>
    %67 = arith.mulf %66, %62 : vector<6x6xf32>
    %cst_40 = arith.constant 9.99999974E-5 : f32
    %68 = vector.broadcast %cst_40 : f32 to vector<6x6xf32>
    %69 = arith.addf %67, %68 : vector<6x6xf32>
    %cst_41 = arith.constant 2.000000e+00 : f32
    %70 = vector.broadcast %cst_41 : f32 to vector<6x6xf32>
    %71 = arith.mulf %70, %65 : vector<6x6xf32>
    %cst_42 = arith.constant 8.99999984E-4 : f32
    %72 = vector.broadcast %cst_42 : f32 to vector<6x6xf32>
    %73 = arith.addf %71, %72 : vector<6x6xf32>
    %74 = arith.mulf %69, %73 : vector<6x6xf32>
    %75 = arith.addf %60, %61 : vector<6x6xf32>
    %cst_43 = arith.constant 9.99999974E-5 : f32
    %76 = vector.broadcast %cst_43 : f32 to vector<6x6xf32>
    %77 = arith.addf %75, %76 : vector<6x6xf32>
    %78 = arith.addf %63, %64 : vector<6x6xf32>
    %cst_44 = arith.constant 8.99999984E-4 : f32
    %79 = vector.broadcast %cst_44 : f32 to vector<6x6xf32>
    %80 = arith.addf %78, %79 : vector<6x6xf32>
    %81 = arith.mulf %77, %80 : vector<6x6xf32>
    %82 = tpu.reciprocal %81 : vector<6x6xf32> -> vector<6x6xf32>
    %83 = arith.mulf %74, %82 : vector<6x6xf32>
    %84 = arith.addf %42, %83 : vector<6x6xf32>
    %c2 = arith.constant 2 : index
    %c0_45 = arith.constant 0 : index
    %c0_46 = arith.constant 0 : index
    %85 = vector.load %arg1[%c2, %c0_45, %c0_46] : memref<4x16x16xf32, #tpu.memory_space<vmem>>, vector<1x16x16xf32>
    %86 = vector.shape_cast %85 : vector<1x16x16xf32> to vector<16x16xf32>
    %c2_47 = arith.constant 2 : index
    %c0_48 = arith.constant 0 : index
    %c0_49 = arith.constant 0 : index
    %87 = vector.load %arg2[%c2_47, %c0_48, %c0_49] : memref<4x16x16xf32, #tpu.memory_space<vmem>>, vector<1x16x16xf32>
    %88 = vector.shape_cast %87 : vector<1x16x16xf32> to vector<16x16xf32>
    %cst_50 = arith.constant dense<0.000000e+00> : vector<16x6xf32>
    %89 = tpu.matmul %86, %1, %cst_50 {dimension_numbers = #tpu.dot_dimension_numbers<[1], [0], [0], [1], [0, 0, 1, 1], [], []>} : vector<16x16xf32>, vector<16x6xf32>, vector<16x6xf32> -> vector<16x6xf32>
    %cst_51 = arith.constant dense<0.000000e+00> : vector<6x6xf32>
    %90 = tpu.matmul %0, %89, %cst_51 {dimension_numbers = #tpu.dot_dimension_numbers<[1], [0], [0], [1], [0, 0, 1, 1], [], []>} : vector<6x16xf32>, vector<16x6xf32>, vector<6x6xf32> -> vector<6x6xf32>
    %cst_52 = arith.constant dense<0.000000e+00> : vector<16x6xf32>
    %91 = tpu.matmul %88, %1, %cst_52 {dimension_numbers = #tpu.dot_dimension_numbers<[1], [0], [0], [1], [0, 0, 1, 1], [], []>} : vector<16x16xf32>, vector<16x6xf32>, vector<16x6xf32> -> vector<16x6xf32>
    %cst_53 = arith.constant dense<0.000000e+00> : vector<6x6xf32>
    %92 = tpu.matmul %0, %91, %cst_53 {dimension_numbers = #tpu.dot_dimension_numbers<[1], [0], [0], [1], [0, 0, 1, 1], [], []>} : vector<6x16xf32>, vector<16x6xf32>, vector<6x6xf32> -> vector<6x6xf32>
    %93 = arith.mulf %86, %86 : vector<16x16xf32>
    %cst_54 = arith.constant dense<0.000000e+00> : vector<16x6xf32>
    %94 = tpu.matmul %93, %1, %cst_54 {dimension_numbers = #tpu.dot_dimension_numbers<[1], [0], [0], [1], [0, 0, 1, 1], [], []>} : vector<16x16xf32>, vector<16x6xf32>, vector<16x6xf32> -> vector<16x6xf32>
    %cst_55 = arith.constant dense<0.000000e+00> : vector<6x6xf32>
    %95 = tpu.matmul %0, %94, %cst_55 {dimension_numbers = #tpu.dot_dimension_numbers<[1], [0], [0], [1], [0, 0, 1, 1], [], []>} : vector<6x16xf32>, vector<16x6xf32>, vector<6x6xf32> -> vector<6x6xf32>
    %96 = arith.mulf %88, %88 : vector<16x16xf32>
    %cst_56 = arith.constant dense<0.000000e+00> : vector<16x6xf32>
    %97 = tpu.matmul %96, %1, %cst_56 {dimension_numbers = #tpu.dot_dimension_numbers<[1], [0], [0], [1], [0, 0, 1, 1], [], []>} : vector<16x16xf32>, vector<16x6xf32>, vector<16x6xf32> -> vector<16x6xf32>
    %cst_57 = arith.constant dense<0.000000e+00> : vector<6x6xf32>
    %98 = tpu.matmul %0, %97, %cst_57 {dimension_numbers = #tpu.dot_dimension_numbers<[1], [0], [0], [1], [0, 0, 1, 1], [], []>} : vector<6x16xf32>, vector<16x6xf32>, vector<6x6xf32> -> vector<6x6xf32>
    %99 = arith.mulf %86, %88 : vector<16x16xf32>
    %cst_58 = arith.constant dense<0.000000e+00> : vector<16x6xf32>
    %100 = tpu.matmul %99, %1, %cst_58 {dimension_numbers = #tpu.dot_dimension_numbers<[1], [0], [0], [1], [0, 0, 1, 1], [], []>} : vector<16x16xf32>, vector<16x6xf32>, vector<16x6xf32> -> vector<16x6xf32>
    %cst_59 = arith.constant dense<0.000000e+00> : vector<6x6xf32>
    %101 = tpu.matmul %0, %100, %cst_59 {dimension_numbers = #tpu.dot_dimension_numbers<[1], [0], [0], [1], [0, 0, 1, 1], [], []>} : vector<6x16xf32>, vector<16x6xf32>, vector<6x6xf32> -> vector<6x6xf32>
    %102 = arith.mulf %90, %90 : vector<6x6xf32>
    %103 = arith.mulf %92, %92 : vector<6x6xf32>
    %104 = arith.mulf %90, %92 : vector<6x6xf32>
    %105 = arith.subf %95, %102 : vector<6x6xf32>
    %106 = arith.subf %98, %103 : vector<6x6xf32>
    %107 = arith.subf %101, %104 : vector<6x6xf32>
    %cst_60 = arith.constant 2.000000e+00 : f32
    %108 = vector.broadcast %cst_60 : f32 to vector<6x6xf32>
    %109 = arith.mulf %108, %104 : vector<6x6xf32>
    %cst_61 = arith.constant 9.99999974E-5 : f32
    %110 = vector.broadcast %cst_61 : f32 to vector<6x6xf32>
    %111 = arith.addf %109, %110 : vector<6x6xf32>
    %cst_62 = arith.constant 2.000000e+00 : f32
    %112 = vector.broadcast %cst_62 : f32 to vector<6x6xf32>
    %113 = arith.mulf %112, %107 : vector<6x6xf32>
    %cst_63 = arith.constant 8.99999984E-4 : f32
    %114 = vector.broadcast %cst_63 : f32 to vector<6x6xf32>
    %115 = arith.addf %113, %114 : vector<6x6xf32>
    %116 = arith.mulf %111, %115 : vector<6x6xf32>
    %117 = arith.addf %102, %103 : vector<6x6xf32>
    %cst_64 = arith.constant 9.99999974E-5 : f32
    %118 = vector.broadcast %cst_64 : f32 to vector<6x6xf32>
    %119 = arith.addf %117, %118 : vector<6x6xf32>
    %120 = arith.addf %105, %106 : vector<6x6xf32>
    %cst_65 = arith.constant 8.99999984E-4 : f32
    %121 = vector.broadcast %cst_65 : f32 to vector<6x6xf32>
    %122 = arith.addf %120, %121 : vector<6x6xf32>
    %123 = arith.mulf %119, %122 : vector<6x6xf32>
    %124 = tpu.reciprocal %123 : vector<6x6xf32> -> vector<6x6xf32>
    %125 = arith.mulf %116, %124 : vector<6x6xf32>
    %126 = arith.addf %84, %125 : vector<6x6xf32>
    %c3 = arith.constant 3 : index
    %c0_66 = arith.constant 0 : index
    %c0_67 = arith.constant 0 : index
    %127 = vector.load %arg1[%c3, %c0_66, %c0_67] : memref<4x16x16xf32, #tpu.memory_space<vmem>>, vector<1x16x16xf32>
    %128 = vector.shape_cast %127 : vector<1x16x16xf32> to vector<16x16xf32>
    %c3_68 = arith.constant 3 : index
    %c0_69 = arith.constant 0 : index
    %c0_70 = arith.constant 0 : index
    %129 = vector.load %arg2[%c3_68, %c0_69, %c0_70] : memref<4x16x16xf32, #tpu.memory_space<vmem>>, vector<1x16x16xf32>
    %130 = vector.shape_cast %129 : vector<1x16x16xf32> to vector<16x16xf32>
    %cst_71 = arith.constant dense<0.000000e+00> : vector<16x6xf32>
    %131 = tpu.matmul %128, %1, %cst_71 {dimension_numbers = #tpu.dot_dimension_numbers<[1], [0], [0], [1], [0, 0, 1, 1], [], []>} : vector<16x16xf32>, vector<16x6xf32>, vector<16x6xf32> -> vector<16x6xf32>
    %cst_72 = arith.constant dense<0.000000e+00> : vector<6x6xf32>
    %132 = tpu.matmul %0, %131, %cst_72 {dimension_numbers = #tpu.dot_dimension_numbers<[1], [0], [0], [1], [0, 0, 1, 1], [], []>} : vector<6x16xf32>, vector<16x6xf32>, vector<6x6xf32> -> vector<6x6xf32>
    %cst_73 = arith.constant dense<0.000000e+00> : vector<16x6xf32>
    %133 = tpu.matmul %130, %1, %cst_73 {dimension_numbers = #tpu.dot_dimension_numbers<[1], [0], [0], [1], [0, 0, 1, 1], [], []>} : vector<16x16xf32>, vector<16x6xf32>, vector<16x6xf32> -> vector<16x6xf32>
    %cst_74 = arith.constant dense<0.000000e+00> : vector<6x6xf32>
    %134 = tpu.matmul %0, %133, %cst_74 {dimension_numbers = #tpu.dot_dimension_numbers<[1], [0], [0], [1], [0, 0, 1, 1], [], []>} : vector<6x16xf32>, vector<16x6xf32>, vector<6x6xf32> -> vector<6x6xf32>
    %135 = arith.mulf %128, %128 : vector<16x16xf32>
    %cst_75 = arith.constant dense<0.000000e+00> : vector<16x6xf32>
    %136 = tpu.matmul %135, %1, %cst_75 {dimension_numbers = #tpu.dot_dimension_numbers<[1], [0], [0], [1], [0, 0, 1, 1], [], []>} : vector<16x16xf32>, vector<16x6xf32>, vector<16x6xf32> -> vector<16x6xf32>
    %cst_76 = arith.constant dense<0.000000e+00> : vector<6x6xf32>
    %137 = tpu.matmul %0, %136, %cst_76 {dimension_numbers = #tpu.dot_dimension_numbers<[1], [0], [0], [1], [0, 0, 1, 1], [], []>} : vector<6x16xf32>, vector<16x6xf32>, vector<6x6xf32> -> vector<6x6xf32>
    %138 = arith.mulf %130, %130 : vector<16x16xf32>
    %cst_77 = arith.constant dense<0.000000e+00> : vector<16x6xf32>
    %139 = tpu.matmul %138, %1, %cst_77 {dimension_numbers = #tpu.dot_dimension_numbers<[1], [0], [0], [1], [0, 0, 1, 1], [], []>} : vector<16x16xf32>, vector<16x6xf32>, vector<16x6xf32> -> vector<16x6xf32>
    %cst_78 = arith.constant dense<0.000000e+00> : vector<6x6xf32>
    %140 = tpu.matmul %0, %139, %cst_78 {dimension_numbers = #tpu.dot_dimension_numbers<[1], [0], [0], [1], [0, 0, 1, 1], [], []>} : vector<6x16xf32>, vector<16x6xf32>, vector<6x6xf32> -> vector<6x6xf32>
    %141 = arith.mulf %128, %130 : vector<16x16xf32>
    %cst_79 = arith.constant dense<0.000000e+00> : vector<16x6xf32>
    %142 = tpu.matmul %141, %1, %cst_79 {dimension_numbers = #tpu.dot_dimension_numbers<[1], [0], [0], [1], [0, 0, 1, 1], [], []>} : vector<16x16xf32>, vector<16x6xf32>, vector<16x6xf32> -> vector<16x6xf32>
    %cst_80 = arith.constant dense<0.000000e+00> : vector<6x6xf32>
    %143 = tpu.matmul %0, %142, %cst_80 {dimension_numbers = #tpu.dot_dimension_numbers<[1], [0], [0], [1], [0, 0, 1, 1], [], []>} : vector<6x16xf32>, vector<16x6xf32>, vector<6x6xf32> -> vector<6x6xf32>
    %144 = arith.mulf %132, %132 : vector<6x6xf32>
    %145 = arith.mulf %134, %134 : vector<6x6xf32>
    %146 = arith.mulf %132, %134 : vector<6x6xf32>
    %147 = arith.subf %137, %144 : vector<6x6xf32>
    %148 = arith.subf %140, %145 : vector<6x6xf32>
    %149 = arith.subf %143, %146 : vector<6x6xf32>
    %cst_81 = arith.constant 2.000000e+00 : f32
    %150 = vector.broadcast %cst_81 : f32 to vector<6x6xf32>
    %151 = arith.mulf %150, %146 : vector<6x6xf32>
    %cst_82 = arith.constant 9.99999974E-5 : f32
    %152 = vector.broadcast %cst_82 : f32 to vector<6x6xf32>
    %153 = arith.addf %151, %152 : vector<6x6xf32>
    %cst_83 = arith.constant 2.000000e+00 : f32
    %154 = vector.broadcast %cst_83 : f32 to vector<6x6xf32>
    %155 = arith.mulf %154, %149 : vector<6x6xf32>
    %cst_84 = arith.constant 8.99999984E-4 : f32
    %156 = vector.broadcast %cst_84 : f32 to vector<6x6xf32>
    %157 = arith.addf %155, %156 : vector<6x6xf32>
    %158 = arith.mulf %153, %157 : vector<6x6xf32>
    %159 = arith.addf %144, %145 : vector<6x6xf32>
    %cst_85 = arith.constant 9.99999974E-5 : f32
    %160 = vector.broadcast %cst_85 : f32 to vector<6x6xf32>
    %161 = arith.addf %159, %160 : vector<6x6xf32>
    %162 = arith.addf %147, %148 : vector<6x6xf32>
    %cst_86 = arith.constant 8.99999984E-4 : f32
    %163 = vector.broadcast %cst_86 : f32 to vector<6x6xf32>
    %164 = arith.addf %162, %163 : vector<6x6xf32>
    %165 = arith.mulf %161, %164 : vector<6x6xf32>
    %166 = tpu.reciprocal %165 : vector<6x6xf32> -> vector<6x6xf32>
    %167 = arith.mulf %158, %166 : vector<6x6xf32>
    %168 = arith.addf %126, %167 : vector<6x6xf32>
    %169 = vector.shape_cast %168 : vector<6x6xf32> to vector<1x6x6xf32>
    %cst_87 = arith.constant dense<0.000000e+00> : vector<1xf32>
    %170 = vector.multi_reduction <add>, %169, %cst_87 [1, 2] : vector<1x6x6xf32> to vector<1xf32>
    %171 = vector.shape_cast %170 : vector<1xf32> to vector<1x1x1xf32>
    %172 = vector.extract %171[0, 0, 0] : f32 from vector<1x1x1xf32>
    %173 = vector.broadcast %172 : f32 to vector<1x1xf32>
    %cst_88 = arith.constant 0.027777778 : f32
    %174 = vector.broadcast %cst_88 : f32 to vector<1x1xf32>
    %175 = arith.mulf %173, %174 : vector<1x1xf32>
    %176 = vector.shape_cast %175 : vector<1x1xf32> to vector<1x1x1xf32>
    %c0_89 = arith.constant 0 : index
    %c0_90 = arith.constant 0 : index
    %c0_91 = arith.constant 0 : index
    %177 = vector.load %arg5[%c0_89, %c0_90, %c0_91] : memref<1x1x1xf32, #tpu.memory_space<vmem>>, vector<1x1x1xf32>
    tpu.vector_store %arg5[%c0_89, %c0_90, %c0_91], %176 {strides = array<i32>} : memref<1x1x1xf32, #tpu.memory_space<vmem>>, vector<1x1x1xf32>,
    return
  }
  func.func @transform_0(%arg0: i32) -> (i32, i32, i32) {
    %c0_i32 = arith.constant 0 : i32
    %c0_i32_0 = arith.constant 0 : i32
    %c0_i32_1 = arith.constant 0 : i32
    return %arg0, %c0_i32, %c0_i32_0 : i32, i32, i32
  }
  func.func @transform_1(%arg0: i32) -> (i32, i32, i32) {
    %c0_i32 = arith.constant 0 : i32
    %c0_i32_0 = arith.constant 0 : i32
    %c0_i32_1 = arith.constant 0 : i32
    return %arg0, %c0_i32, %c0_i32_0 : i32, i32, i32
  }
  func.func @transform_2(%arg0: i32) -> (i32, i32) {
    %c0_i32 = arith.constant 0 : i32
    %c0_i32_0 = arith.constant 0 : i32
    %c0_i32_1 = arith.constant 0 : i32
    return %c0_i32, %c0_i32_0 : i32, i32
  }
  func.func @transform_3(%arg0: i32) -> (i32, i32) {
    %c0_i32 = arith.constant 0 : i32
    %c0_i32_0 = arith.constant 0 : i32
    %c0_i32_1 = arith.constant 0 : i32
    return %c0_i32, %c0_i32_0 : i32, i32
  }
  func.func @transform_4(%arg0: i32) -> (i32, i32, i32) {
    %c0_i32 = arith.constant 0 : i32
    %c0_i32_0 = arith.constant 0 : i32
    %c0_i32_1 = arith.constant 0 : i32
    return %arg0, %c0_i32, %c0_i32_0 : i32, i32, i32
  }
}

</mosaic_0001>

<bundles_post_ra>
// kernel: tpu_custom_call.1
= control target key start
LH: loop header
LB: loop body
LE: loop exit
PB: predicated region body
PF: predicated region fallthrough
CT: control target
= control target key end

     0   :  { %9 = vsyncpa [#allocation3], 0  ;;  %s4727_s0 = inlined_call_operand.hbm [shape: f32[8,16,16], index: 0, kind: input, shape index: {}]   ;;  %s4728_s1 = inlined_call_operand.hbm [shape: f32[8,16,16], index: 1, kind: input, shape index: {}]   ;;  %s4729_s2 = inlined_call_operand.vmem [shape: f32[6,16], index: 2, kind: input, shape index: {}]   ;;  %s4730_s3 = inlined_call_operand.vmem [shape: f32[16,6], index: 3, kind: input, shape index: {}]   ;;  %s4731_s4 = inlined_call_operand.vmem [shape: f32[2,1,1], index: 4, kind: output, shape index: {}]  }
   0x1   :  { %11 = vsyncpa [#allocation3 + $0x1], 0 }
   0x2   :  { %12 = vsyncpa [#allocation5], 0 }
   0x3   :  { %14 = vsyncpa [#allocation5 + $0x1], 0  ;;  %s4346_s15 = smov 0   ;;  %s4348_s16 = smov 0  }
   0x4   :  { %s4350_s17 = smov 0   ;;  %s4352_s18 = smov 0  }
   0x5 LB: > { %s4365_s19 = sadd.s32 4294967295, %s4312_s18   ;;  %s4368_s20 = sadd.s32 1, %s4312_s18   ;;  %s4312_s18 = sphi %s4352_s18, %s4741_s18   ;;  %s4308_s17 = sphi %s4350_s17, %s4740_s17   ;;  %s4304_s16 = sphi %s4348_s16, %s4739_s16   ;;  %s4300_s15 = sphi %s4346_s15, %s4738_s15  }
   0x6   : > { %s24_s21 = ssub.s32 %s4312_s18, %s4368_s20  ;;  %s27_s22 = sadd.s32 1, %s4308_s17 }
   0x7   : > { %p25_p0 = scmp.eq.s32.totalorder %s24_s21, 0  ;;  %p34_p1 = scmp.ne.s32.totalorder %s4308_s17, %s4304_s16 }
   0x8   : > { %p35_p2 = scmp.eq.s32.totalorder %s4312_s18, 0  ;;  %p40_p3 = scmp.ne.s32.totalorder %s4304_s16, %s4300_s15 }
   0x9   : > { %s4378_s23 = scalar_select %p25_p0, %s4308_s17, %s27_s22  }
   0xa   : > { %p36_p4 = por %p35_p2, %p34_p1  ;;  %p41_p5 = scmp.eq.s32.totalorder %s4365_s19, 0 }
   0xb   : > { %p4168_p6 = scmp.lt.s32.totalorder %s4312_s18, 2  ;;  %s4387_s25 = sand.u32 1, %s4308_s17  }
   0xc   : > { %p4382_p7 = por %p41_p5, %p40_p3  ;;  %s3506_s26 = sshll.u32 %s4387_s25, 6 }
   0xd   : > { %s3592_s27 = sshll.u32 %s4312_s18, 10  ;;  %s168_s5 = scalar_lea.vmem [#allocation2], %s3506_s26 }
   0xe   : > { %s4733_s24 = scalar_select %p4382_p7, 1, 0 }
   0xf   : > { %s4396_s30 = scalar_lea.hbm %s4727_s0, %s3592_s27  ;;  %s176_s6 = sshll.u32 %s168_s5, 4  ;;  %s4400_s6 = int_to_ptr.vmem [resolvable:$true] %s176_s6 }
  0x10   : > { %p4402_p8 = pnand %p4168_p6, %p36_p4  ;;  %s165_s8 = scalar_lea.sflag [#allocation3], %s4387_s25 }
  0x11   : > { %s4214_s9 = scalar_lea.hbm %s4396_s30, 1024  ;;  %s4219_s12 = scalar_lea.hbm %s4727_s0, 2048 }
  0x12   : > { %p4215_p10 = scmp.ne.s32.totalorder %s4396_s30, %s4214_s9  ;;  %p4216_p11 = pneg %p4402_p8 }
  0x13   : > { %p4220_p0 = scmp.lt.u32.totalorder %s4396_s30, %s4727_s0  ;;  %p4221_p1 = scmp.lt.u32.totalorder %s4219_s12, %s4214_s9 }
  0x14   : > { %p4217_p12 = pnand %p4216_p11, %p4215_p10  ;;  %p4223_p3 = scmp.lt.u32.totalorder %s4214_s9, %s4396_s30 }
  0x15   : > { %p4222_p2 = por %p4221_p1, %p4220_p0 }
  0x16   : > { %p4218_p13 = pneg %p4217_p12 }
  0x17   : > { %p4224_p4 = por %p4223_p3, %p4222_p2 }
  0x19   : > { %p4225_p5 = pnand %p4224_p4, %p4218_p13 }
  0x1b   : > { %4228 = shalt.err (!%p4225_p5)
}
  0x1c   : > { %s4229_s15 = scalar_lea.vmem %s4400_s6, 1024  ;;  %s4314_s21 = smov [#allocation2]  }
  0x1d   : > { %p4230_p6 = scmp.ne.s32.totalorder %s4400_s6, %s4229_s15  ;;  %s4234_s22 = sshll.u32 %s4314_s21, 4  ;;  %s4235_s22 = int_to_ptr.vmem [resolvable:$false] %s4234_s22 }
  0x1e   : > { %s4236_s28 = scalar_lea.vmem %s4235_s22, 2048  ;;  %p4237_p9 = scmp.lt.s32.totalorder %s4400_s6, %s4235_s22 }
  0x1f   : > { %p4232_p10 = pnand %p4230_p6, %p4216_p11  ;;  %p4238_p0 = scmp.lt.s32.totalorder %s4236_s28, %s4229_s15 }
  0x21   : > { %p4233_p12 = pneg %p4232_p10  ;;  %p4239_p1 = por %p4238_p0, %p4237_p9 }
  0x23   : > { %p4240_p2 = pnand %p4239_p1, %p4233_p12 }
  0x25   : > { %4243 = shalt.err (!%p4240_p2)
}
  0x26   : > { %s4315_s29 = smov 128   ;;  %s4316_s5 = smov 8  }
  0x27   : > { %4164 = dma.hbm_to_vmem [thread:$0]  (!%p4402_p8), %s4396_s30, 1024, %s4400_s6, %s165_s8, %s4315_s29, %s4315_s29, %s4316_s5  }
  0x28   : > { %p206_p9 = scmp.lt.s32.totalorder %s4312_s18, 3  ;;  %s4444_s11 = scalar_lea.hbm %s4728_s1, %s3592_s27 }
  0x29   : > { %p4735_p13 = scmp.ge.s32.totalorder %s4312_s18, 1  ;;  %s190_s13 = scalar_lea.vmem [#allocation4], %s3506_s26 }
  0x2a   : > { %s198_s14 = sshll.u32 %s190_s13, 4  ;;  %s187_s30 = scalar_lea.sflag [#allocation5], %s4387_s25  ;;  %s4454_s14 = int_to_ptr.vmem [resolvable:$true] %s198_s14 }
  0x2b   : > { %p4448_p3 = pnand %p4735_p13, %p206_p9  ;;  %s4244_s6 = scalar_lea.hbm %s4444_s11, 1024 }
  0x2c   : > { %p4245_p4 = scmp.ne.s32.totalorder %s4444_s11, %s4244_s6  ;;  %s4249_s8 = scalar_lea.hbm %s4728_s1, 2048 }
  0x2d   : > { %p4250_p10 = scmp.lt.u32.totalorder %s4444_s11, %s4728_s1  ;;  %p4251_p12 = scmp.lt.u32.totalorder %s4249_s8, %s4244_s6 }
  0x2e   : > { %p4247_p5 = pnand %p4245_p4, %p4216_p11  ;;  %p4253_p1 = scmp.lt.u32.totalorder %s4244_s6, %s4444_s11 }
  0x2f   : > { %p4252_p0 = por %p4251_p12, %p4250_p10 }
  0x30   : > { %p4248_p6 = pneg %p4247_p5 }
  0x31   : > { %p4254_p2 = por %p4253_p1, %p4252_p0 }
  0x33   : > { %p4255_p9 = pnand %p4254_p2, %p4248_p6 }
  0x35   : > { %4258 = shalt.err (!%p4255_p9)
}
  0x36   : > { %s4259_s26 = scalar_lea.vmem %s4454_s14, 1024  ;;  %s4317_s22 = smov [#allocation4]  }
  0x37   : > { %p4260_p13 = scmp.ne.s32.totalorder %s4454_s14, %s4259_s26  ;;  %s4264_s28 = sshll.u32 %s4317_s22, 4  ;;  %s4265_s28 = int_to_ptr.vmem [resolvable:$false] %s4264_s28 }
  0x38   : > { %s4266_s9 = scalar_lea.vmem %s4265_s28, 2048  ;;  %p4267_p7 = scmp.lt.s32.totalorder %s4454_s14, %s4265_s28 }
  0x39   : > { %p4262_p4 = pnand %p4260_p13, %p4216_p11  ;;  %p4268_p10 = scmp.lt.s32.totalorder %s4266_s9, %s4259_s26 }
  0x3b   : > { %p4263_p5 = pneg %p4262_p4  ;;  %p4269_p12 = por %p4268_p10, %p4267_p7 }
  0x3d   : > { %p4270_p0 = pnand %p4269_p12, %p4263_p5 }
  0x3f   : > { %4273 = shalt.err (!%p4270_p0)
}
  0x40   : > { %4167 = dma.hbm_to_vmem [thread:$0]  (!%p4402_p8), %s4444_s11, 1024, %s4454_s14, %s187_s30, %s4315_s29, %s4315_s29, %s4316_s5  }
  0x41   : > { %210 = sbr.rel (%p4448_p3) target bundleno = 816 (0x330), region = 36  ;;  %s212_s10 = sand.u32 (!%p4448_p3), 1, %s4304_s16  }
  0x42   : > { %s3515_s13 = sshll.u32 (!%p4448_p3), %s212_s10, 6  ;;  %s213_s6 = scalar_lea.sflag (!%p4448_p3), [#allocation3], %s212_s10 }
  0x43   : > { %s4488_s18 = scalar_lea.vmem (!%p4448_p3), [#allocation2], %s3515_s13  ;;  %p4737_p7 = scmp.ne.s32.totalorder (!%p4448_p3), %s4733_s24, 0 }
  0x48   : > { %4291 = dma.done.wait (%p4737_p7), %s213_s6, 1024  }
  0x49   : > { %4293 = vsyncadd (%p4737_p7), %s213_s6, 4294966272  ;;  %s222_s25 = scalar_lea.sflag [#allocation5], %s212_s10  ;;  %s4494_s7 = scalar_lea.vmem [#allocation4], %s3515_s13 }
  0x4a   : > { %4295 = dma.done.wait (%p4737_p7), %s222_s25, 1024  }
  0x4b   : > { %4297 = vsyncadd (%p4737_p7), %s222_s25, 4294966272  ;;  %vm265_vm0 = vcmask 130048   ;;  %v259_v0 = vld [vmem:[%s4730_s3] sm:$0xff]  ;;  %v260_v1 = vld [vmem:[%s4730_s3 + $0x8] sm:$0xff]  ;;  %v4318_v43 = vmov 0.0|0.0   ;;  %vm4319_vm1 = vmmov 0  }
  0x4c   : > { %v261_v2 = vld [vmem:[%s4488_s18] sm:$0xff]  ;;  %v4507_v3 = vpack.c.bf16 %v260_v1, %v259_v0  ;;  %v262_v4 = vld [vmem:[%s4488_s18 + $0x8] sm:$0xff]  ;;  %v3532_v13 = vld [vmem:[%s4488_s18 + $0x10] sm:$0xff]  ;;  %4019 = vmatprep.subr.bf16.mxu1 %v4318_v43  ;;  %v4320_v44 = vmov 0.0   ;;  %vm3406_vm2 = vcmask 46080   ;;  %p255_p8 = scmp.lt.s32.totalorder %s4365_s19, 1 }
  0x4d   : > { %3739 = vmatprep.mubr.msk.f32.mxu0 %vm265_vm0, %v261_v2  ;;  %v263_v5 = vld [vmem:[%s4494_s7] sm:$0xff]  ;;  %v571_v6 = vmul.f32 %v261_v2, %v261_v2  ;;  %v264_v7 = vld [vmem:[%s4494_s7 + $0x8] sm:$0xff]  ;;  %v572_v8 = vmul.f32 %v262_v4, %v262_v4  ;;  %v3533_v14 = vld [vmem:[%s4488_s18 + $0x18] sm:$0xff]  ;;  %v1356_v16 = vmul.f32 %v3532_v13, %v3532_v13  ;;  %3746 = vmatprep.mubr.msk.f32.mxu1 %vm4319_vm1, %v4320_v44  ;;  %vm3419_vm3 = vcmask 0  }
  0x4e   : > { %4016 = vmatprep.subr.bf16.mxu0 %v4507_v3  ;;  %v724_v9 = vmul.f32 %v263_v5, %v263_v5  ;;  %v725_v10 = vmul.f32 %v264_v7, %v264_v7  ;;  %v877_v11 = vmul.f32 %v263_v5, %v261_v2  ;;  %v878_v12 = vmul.f32 %v264_v7, %v262_v4  ;;  %v3534_v15 = vld [vmem:[%s4494_s7 + $0x10] sm:$0xff]  ;;  %v3535_v17 = vld [vmem:[%s4494_s7 + $0x18] sm:$0xff]  ;;  %v3551_v23 = vld [vmem:[%s4488_s18 + $0x20] sm:$0xff]  ;;  %s4743_s19 = smov (!%p255_p8, %s4365_s19), 1 }
  0x4f   : > { %4018 = vmatpush3.bf16.msra.mxu0 %v4507_v3  ;;  %v1357_v18 = vmul.f32 %v3533_v14, %v3533_v14  ;;  %v1509_v19 = vmul.f32 %v3534_v15, %v3534_v15  ;;  %v1510_v20 = vmul.f32 %v3535_v17, %v3535_v17  ;;  %v1662_v21 = vmul.f32 %v3534_v15, %v3532_v13  ;;  %v3552_v24 = vld [vmem:[%s4488_s18 + $0x28] sm:$0xff]  ;;  %v3553_v25 = vld [vmem:[%s4494_s7 + $0x20] sm:$0xff]  ;;  %v3570_v33 = vld [vmem:[%s4488_s18 + $0x30] sm:$0xff]  ;;  %s257_s15 = scalar_lea.vmem %s4731_s4, %s4743_s19 }
  0x50   : > { %4023 = vmatprep.subr.bf16.mxu0 %v4507_v3  ;;  %v1663_v22 = vmul.f32 %v3535_v17, %v3533_v14  ;;  %v2142_v26 = vmul.f32 %v3551_v23, %v3551_v23  ;;  %v3554_v27 = vld [vmem:[%s4494_s7 + $0x28] sm:$0xff]  ;;  %v2143_v28 = vmul.f32 %v3552_v24, %v3552_v24  ;;  %v2295_v29 = vmul.f32 %v3553_v25, %v3553_v25  ;;  %v3571_v34 = vld [vmem:[%s4488_s18 + $0x38] sm:$0xff]  ;;  %v3572_v35 = vld [vmem:[%s4494_s7 + $0x30] sm:$0xff] }
  0x51   : > { %v2296_v30 = vmul.f32 %v3554_v27, %v3554_v27  ;;  %v2448_v31 = vmul.f32 %v3553_v25, %v3551_v23  ;;  %v2449_v32 = vmul.f32 %v3554_v27, %v3552_v24  ;;  %v2928_v36 = vmul.f32 %v3570_v33, %v3570_v33  ;;  %v3573_v37 = vld [vmem:[%s4494_s7 + $0x38] sm:$0xff]  ;;  %v4610_v49 = vld [vmem:[%s4729_s2] sm:$0x3f] }
  0x52   : > { %3740 = vmatmul.mubr.msk.f32.vlgmr.msra.gmra.mrb[0].mxu0 %vm265_vm0, %v262_v4  ;;  %v2929_v38 = vmul.f32 %v3571_v34, %v3571_v34  ;;  %v3081_v39 = vmul.f32 %v3572_v35, %v3572_v35  ;;  %v3082_v40 = vmul.f32 %v3573_v37, %v3573_v37  ;;  %v3234_v41 = vmul.f32 %v3572_v35, %v3570_v33 }
  0x53   : > { %4025 = vmatpush3.bf16.msra.mxu0 %v4507_v3  ;;  %3753 = vmatprep.mubr.msk.f32.mxu0 %vm265_vm0, %v263_v5  ;;  %v3235_v42 = vmul.f32 %v3573_v37, %v3571_v34 }
  0x54   : > { %4030 = vmatprep.subr.bf16.mxu0 %v4507_v3 }
  0x56   : > { %3754 = vmatmul.mubr.msk.f32.vlgmr.msra.gmra.mrb[2].mxu0 %vm265_vm0, %v264_v7 }
  0x57   : > { %4032 = vmatpush3.bf16.msra.mxu0 %v4507_v3  ;;  %3767 = vmatprep.mubr.msk.f32.mxu0 %vm265_vm0, %v571_v6 }
  0x58   : > { %4037 = vmatprep.subr.bf16.mxu0 %v4507_v3 }
  0x5a   : > { %3768 = vmatmul.mubr.msk.f32.vlgmr.msra.gmra.mrb[4].mxu0 %vm265_vm0, %v572_v8 }
  0x5b   : > { %4039 = vmatpush3.bf16.msra.mxu0 %v4507_v3  ;;  %3781 = vmatprep.mubr.msk.f32.mxu0 %vm265_vm0, %v724_v9 }
  0x5c   : > { %4044 = vmatprep.subr.bf16.mxu0 %v4507_v3 }
  0x5e   : > { %3782 = vmatmul.mubr.msk.f32.vlgmr.msra.gmra.mrb[6].mxu0 %vm265_vm0, %v725_v10 }
  0x5f   : > { %4046 = vmatpush3.bf16.msra.mxu0 %v4507_v3  ;;  %3795 = vmatprep.mubr.msk.f32.mxu0 %vm265_vm0, %v877_v11 }
  0x60   : > { %4051 = vmatprep.subr.bf16.mxu0 %v4507_v3 }
  0x62   : > { %3796 = vmatmul.mubr.msk.f32.vlgmr.msra.gmra.mrb[8].mxu0 %vm265_vm0, %v878_v12 }
  0x63   : > { %4053 = vmatpush3.bf16.msra.mxu0 %v4507_v3  ;;  %3809 = vmatprep.mubr.msk.f32.mxu0 %vm265_vm0, %v3532_v13 }
  0x64   : > { %4058 = vmatprep.subr.bf16.mxu0 %v4507_v3 }
  0x66   : > { %3810 = vmatmul.mubr.msk.f32.vlgmr.msra.gmra.mrb[10].mxu0 %vm265_vm0, %v3533_v14 }
  0x67   : > { %4060 = vmatpush3.bf16.msra.mxu0 %v4507_v3  ;;  %3823 = vmatprep.mubr.msk.f32.mxu0 %vm265_vm0, %v3534_v15 }
  0x68   : > { %4065 = vmatprep.subr.bf16.mxu0 %v4507_v3 }
  0x6a   : > { %3824 = vmatmul.mubr.msk.f32.vlgmr.msra.gmra.mrb[12].mxu0 %vm265_vm0, %v3535_v17 }
  0x6b   : > { %4067 = vmatpush3.bf16.msra.mxu0 %v4507_v3  ;;  %3837 = vmatprep.mubr.msk.f32.mxu0 %vm265_vm0, %v1356_v16 }
  0x6c   : > { %4072 = vmatprep.subr.bf16.mxu0 %v4507_v3 }
  0x6e   : > { %3838 = vmatmul.mubr.msk.f32.vlgmr.msra.gmra.mrb[14].mxu0 %vm265_vm0, %v1357_v18 }
  0x6f   : > { %4074 = vmatpush3.bf16.msra.mxu0 %v4507_v3  ;;  %3851 = vmatprep.mubr.msk.f32.mxu0 %vm265_vm0, %v1509_v19 }
  0x70   : > { %4079 = vmatprep.subr.bf16.mxu0 %v4507_v3 }
  0x72   : > { %3852 = vmatmul.mubr.msk.f32.vlgmr.msra.gmra.mrb[16].mxu0 %vm265_vm0, %v1510_v20 }
  0x73   : > { %4081 = vmatpush3.bf16.msra.mxu0 %v4507_v3  ;;  %3865 = vmatprep.mubr.msk.f32.mxu0 %vm265_vm0, %v1662_v21 }
  0x74   : > { %4086 = vmatprep.subr.bf16.mxu0 %v4507_v3 }
  0x76   : > { %3866 = vmatmul.mubr.msk.f32.vlgmr.msra.gmra.mrb[18].mxu0 %vm265_vm0, %v1663_v22 }
  0x77   : > { %4088 = vmatpush3.bf16.msra.mxu0 %v4507_v3  ;;  %3879 = vmatprep.mubr.msk.f32.mxu0 %vm265_vm0, %v3551_v23 }
  0x78   : > { %4093 = vmatprep.subr.bf16.mxu0 %v4507_v3 }
  0x7a   : > { %3880 = vmatmul.mubr.msk.f32.vlgmr.msra.gmra.mrb[20].mxu0 %vm265_vm0, %v3552_v24 }
  0x7b   : > { %4095 = vmatpush3.bf16.msra.mxu0 %v4507_v3  ;;  %3893 = vmatprep.mubr.msk.f32.mxu0 %vm265_vm0, %v3553_v25 }
  0x7c   : > { %4100 = vmatprep.subr.bf16.mxu0 %v4507_v3 }
  0x7e   : > { %3894 = vmatmul.mubr.msk.f32.vlgmr.msra.gmra.mrb[22].mxu0 %vm265_vm0, %v3554_v27 }
  0x7f   : > { %4102 = vmatpush3.bf16.msra.mxu0 %v4507_v3  ;;  %3907 = vmatprep.mubr.msk.f32.mxu0 %vm265_vm0, %v2142_v26 }
  0x80   : > { %4107 = vmatprep.subr.bf16.mxu0 %v4507_v3 }
  0x82   : > { %3908 = vmatmul.mubr.msk.f32.vlgmr.msra.gmra.mrb[24].mxu0 %vm265_vm0, %v2143_v28 }
  0x83   : > { %4109 = vmatpush3.bf16.msra.mxu0 %v4507_v3  ;;  %3921 = vmatprep.mubr.msk.f32.mxu0 %vm265_vm0, %v2295_v29 }
  0x84   : > { %4114 = vmatprep.subr.bf16.mxu0 %v4507_v3 }
  0x86   : > { %3922 = vmatmul.mubr.msk.f32.vlgmr.msra.gmra.mrb[26].mxu0 %vm265_vm0, %v2296_v30 }
  0x87   : > { %4116 = vmatpush3.bf16.msra.mxu0 %v4507_v3  ;;  %3935 = vmatprep.mubr.msk.f32.mxu0 %vm265_vm0, %v2448_v31 }
  0x88   : > { %4121 = vmatprep.subr.bf16.mxu0 %v4507_v3 }
  0x8a   : > { %3936 = vmatmul.mubr.msk.f32.vlgmr.msra.gmra.mrb[28].mxu0 %vm265_vm0, %v2449_v32 }
  0x8b   : > { %4123 = vmatpush3.bf16.msra.mxu0 %v4507_v3  ;;  %3949 = vmatprep.mubr.msk.f32.mxu0 %vm265_vm0, %v3570_v33 }
  0x8c   : > { %4128 = vmatprep.subr.bf16.mxu0 %v4507_v3 }
  0x8e   : > { %3950 = vmatmul.mubr.msk.f32.vlgmr.msra.gmra.mrb[30].mxu0 %vm265_vm0, %v3571_v34 }
  0x8f   : > { %4130 = vmatpush3.bf16.msra.mxu0 %v4507_v3  ;;  %3963 = vmatprep.mubr.msk.f32.mxu0 %vm265_vm0, %v3572_v35 }
  0x90   : > { %4135 = vmatprep.subr.bf16.mxu0 %v4507_v3 }
  0x92   : > { %3964 = vmatmul.mubr.msk.f32.vlgmr.msra.gmra.mrb[32].mxu0 %vm265_vm0, %v3573_v37 }
  0x93   : > { %4137 = vmatpush3.bf16.msra.mxu0 %v4507_v3  ;;  %3977 = vmatprep.mubr.msk.f32.mxu0 %vm265_vm0, %v2928_v36 }
  0x94   : > { %4142 = vmatprep.subr.bf16.mxu0 %v4507_v3 }
  0x96   : > { %3978 = vmatmul.mubr.msk.f32.vlgmr.msra.gmra.mrb[34].mxu0 %vm265_vm0, %v2929_v38 }
  0x97   : > { %4144 = vmatpush3.bf16.msra.mxu0 %v4507_v3  ;;  %3991 = vmatprep.mubr.msk.f32.mxu0 %vm265_vm0, %v3081_v39 }
  0x98   : > { %4149 = vmatprep.subr.bf16.mxu0 %v4507_v3 }
  0x9a   : > { %3992 = vmatmul.mubr.msk.f32.vlgmr.msra.gmra.mrb[36].mxu0 %vm265_vm0, %v3082_v40 }
  0x9b   : > { %4151 = vmatpush3.bf16.msra.mxu0 %v4507_v3  ;;  %4005 = vmatprep.mubr.msk.f32.mxu0 %vm265_vm0, %v3234_v41 }
  0x9e   : > { %4006 = vmatmul.mubr.msk.f32.vlgmr.msra.gmra.mrb[38].mxu0 %vm265_vm0, %v3235_v42 }
 0x125   : > { %v3741_v45 = vpop.f32.mrb[0].mxu0 }
 0x126   : > { %v338_v46 = vpop.f32.mrb[1].mxu0 }
 0x127   : > { %v4020_v47 = vpack.c.bf16 %v3741_v45, %v338_v46 }
 0x129   : > { %4021 = vmatpush3.bf16.msra.mxu1 %v4020_v47  ;;  %v3755_v48 = vpop.f32.mrb[2].mxu0 }
 0x12a   : > { %v492_v50 = vpop.f32.mrb[3].mxu0  ;;  %4026 = vmatprep.subr.bf16.mxu1 %v4318_v43 }
 0x12b   : > { %v4027_v51 = vpack.c.bf16 %v3755_v48, %v492_v50 }
 0x12c   : > { %3747 = vmatmul.mubr.msk.f32.vlgmr.msra.gmra.mrb[0].mxu1 %vm265_vm0, %v4610_v49 }
 0x12d   : > { %4028 = vmatpush3.bf16.msra.mxu1 %v4027_v51  ;;  %v3769_v52 = vpop.f32.mrb[4].mxu0  ;;  %3760 = vmatprep.mubr.msk.f32.mxu1 %vm4319_vm1, %v4320_v44 }
 0x12e   : > { %v645_v53 = vpop.f32.mrb[5].mxu0  ;;  %4033 = vmatprep.subr.bf16.mxu1 %v4318_v43 }
 0x12f   : > { %v4034_v54 = vpack.c.bf16 %v3769_v52, %v645_v53 }
 0x130   : > { %3761 = vmatmul.mubr.msk.f32.vlgmr.msra.gmra.mrb[2].mxu1 %vm265_vm0, %v4610_v49 }
 0x131   : > { %4035 = vmatpush3.bf16.msra.mxu1 %v4034_v54  ;;  %v3783_v55 = vpop.f32.mrb[6].mxu0  ;;  %3774 = vmatprep.mubr.msk.f32.mxu1 %vm4319_vm1, %v4320_v44 }
 0x132   : > { %v798_v56 = vpop.f32.mrb[7].mxu0  ;;  %4040 = vmatprep.subr.bf16.mxu1 %v4318_v43 }
 0x133   : > { %v4041_v57 = vpack.c.bf16 %v3783_v55, %v798_v56 }
 0x134   : > { %3775 = vmatmul.mubr.msk.f32.vlgmr.msra.gmra.mrb[4].mxu1 %vm265_vm0, %v4610_v49 }
 0x135   : > { %4042 = vmatpush3.bf16.msra.mxu1 %v4041_v57  ;;  %v3797_v58 = vpop.f32.mrb[8].mxu0  ;;  %3788 = vmatprep.mubr.msk.f32.mxu1 %vm4319_vm1, %v4320_v44 }
 0x136   : > { %v951_v59 = vpop.f32.mrb[9].mxu0  ;;  %4047 = vmatprep.subr.bf16.mxu1 %v4318_v43 }
 0x137   : > { %v4048_v60 = vpack.c.bf16 %v3797_v58, %v951_v59 }
 0x138   : > { %3789 = vmatmul.mubr.msk.f32.vlgmr.msra.gmra.mrb[6].mxu1 %vm265_vm0, %v4610_v49 }
 0x139   : > { %4049 = vmatpush3.bf16.msra.mxu1 %v4048_v60  ;;  %v3811_v61 = vpop.f32.mrb[10].mxu0  ;;  %3802 = vmatprep.mubr.msk.f32.mxu1 %vm4319_vm1, %v4320_v44 }
 0x13a   : > { %v1126_v62 = vpop.f32.mrb[11].mxu0  ;;  %4054 = vmatprep.subr.bf16.mxu1 %v4318_v43 }
 0x13b   : > { %v4055_v63 = vpack.c.bf16 %v3811_v61, %v1126_v62 }
 0x13c   : > { %3803 = vmatmul.mubr.msk.f32.vlgmr.msra.gmra.mrb[8].mxu1 %vm265_vm0, %v4610_v49 }
 0x13d   : > { %4056 = vmatpush3.bf16.msra.mxu1 %v4055_v63  ;;  %v3825_v0 = vpop.f32.mrb[12].mxu0  ;;  %3816 = vmatprep.mubr.msk.f32.mxu1 %vm4319_vm1, %v4320_v44 }
 0x13e   : > { %v1277_v1 = vpop.f32.mrb[13].mxu0  ;;  %4061 = vmatprep.subr.bf16.mxu1 %v4318_v43 }
 0x13f   : > { %v4062_v2 = vpack.c.bf16 %v3825_v0, %v1277_v1 }
 0x140   : > { %3817 = vmatmul.mubr.msk.f32.vlgmr.msra.gmra.mrb[10].mxu1 %vm265_vm0, %v4610_v49 }
 0x141   : > { %4063 = vmatpush3.bf16.msra.mxu1 %v4062_v2  ;;  %v3839_v3 = vpop.f32.mrb[14].mxu0  ;;  %3830 = vmatprep.mubr.msk.f32.mxu1 %vm4319_vm1, %v4320_v44 }
 0x142   : > { %v1430_v4 = vpop.f32.mrb[15].mxu0  ;;  %4068 = vmatprep.subr.bf16.mxu1 %v4318_v43 }
 0x143   : > { %v4069_v5 = vpack.c.bf16 %v3839_v3, %v1430_v4 }
 0x144   : > { %3831 = vmatmul.mubr.msk.f32.vlgmr.msra.gmra.mrb[12].mxu1 %vm265_vm0, %v4610_v49 }
 0x145   : > { %4070 = vmatpush3.bf16.msra.mxu1 %v4069_v5  ;;  %v3853_v6 = vpop.f32.mrb[16].mxu0  ;;  %3844 = vmatprep.mubr.msk.f32.mxu1 %vm4319_vm1, %v4320_v44 }
 0x146   : > { %v1583_v7 = vpop.f32.mrb[17].mxu0  ;;  %4075 = vmatprep.subr.bf16.mxu1 %v4318_v43 }
 0x147   : > { %v4076_v8 = vpack.c.bf16 %v3853_v6, %v1583_v7 }
 0x148   : > { %3845 = vmatmul.mubr.msk.f32.vlgmr.msra.gmra.mrb[14].mxu1 %vm265_vm0, %v4610_v49 }
 0x149   : > { %4077 = vmatpush3.bf16.msra.mxu1 %v4076_v8  ;;  %v3867_v9 = vpop.f32.mrb[18].mxu0  ;;  %3858 = vmatprep.mubr.msk.f32.mxu1 %vm4319_vm1, %v4320_v44 }
 0x14a   : > { %v1736_v10 = vpop.f32.mrb[19].mxu0  ;;  %4082 = vmatprep.subr.bf16.mxu1 %v4318_v43 }
 0x14b   : > { %v4083_v11 = vpack.c.bf16 %v3867_v9, %v1736_v10 }
 0x14c   : > { %3859 = vmatmul.mubr.msk.f32.vlgmr.msra.gmra.mrb[16].mxu1 %vm265_vm0, %v4610_v49 }
 0x14d   : > { %4084 = vmatpush3.bf16.msra.mxu1 %v4083_v11  ;;  %v3881_v12 = vpop.f32.mrb[20].mxu0  ;;  %3872 = vmatprep.mubr.msk.f32.mxu1 %vm4319_vm1, %v4320_v44 }
 0x14e   : > { %v1912_v13 = vpop.f32.mrb[21].mxu0  ;;  %4089 = vmatprep.subr.bf16.mxu1 %v4318_v43 }
 0x14f   : > { %v4090_v14 = vpack.c.bf16 %v3881_v12, %v1912_v13 }
 0x150   : > { %3873 = vmatmul.mubr.msk.f32.vlgmr.msra.gmra.mrb[18].mxu1 %vm265_vm0, %v4610_v49 }
 0x151   : > { %4091 = vmatpush3.bf16.msra.mxu1 %v4090_v14  ;;  %v3895_v15 = vpop.f32.mrb[22].mxu0  ;;  %3886 = vmatprep.mubr.msk.f32.mxu1 %vm4319_vm1, %v4320_v44 }
 0x152   : > { %v2063_v16 = vpop.f32.mrb[23].mxu0  ;;  %4096 = vmatprep.subr.bf16.mxu1 %v4318_v43 }
 0x153   : > { %v4097_v17 = vpack.c.bf16 %v3895_v15, %v2063_v16 }
 0x154   : > { %3887 = vmatmul.mubr.msk.f32.vlgmr.msra.gmra.mrb[20].mxu1 %vm265_vm0, %v4610_v49 }
 0x155   : > { %4098 = vmatpush3.bf16.msra.mxu1 %v4097_v17  ;;  %v3909_v18 = vpop.f32.mrb[24].mxu0  ;;  %3900 = vmatprep.mubr.msk.f32.mxu1 %vm4319_vm1, %v4320_v44 }
 0x156   : > { %v2216_v19 = vpop.f32.mrb[25].mxu0  ;;  %4103 = vmatprep.subr.bf16.mxu1 %v4318_v43 }
 0x157   : > { %v4104_v20 = vpack.c.bf16 %v3909_v18, %v2216_v19 }
 0x158   : > { %3901 = vmatmul.mubr.msk.f32.vlgmr.msra.gmra.mrb[22].mxu1 %vm265_vm0, %v4610_v49 }
 0x159   : > { %4105 = vmatpush3.bf16.msra.mxu1 %v4104_v20  ;;  %v3923_v21 = vpop.f32.mrb[26].mxu0  ;;  %3914 = vmatprep.mubr.msk.f32.mxu1 %vm4319_vm1, %v4320_v44 }
 0x15a   : > { %v2369_v22 = vpop.f32.mrb[27].mxu0  ;;  %4110 = vmatprep.subr.bf16.mxu1 %v4318_v43 }
 0x15b   : > { %v4111_v23 = vpack.c.bf16 %v3923_v21, %v2369_v22 }
 0x15c   : > { %3915 = vmatmul.mubr.msk.f32.vlgmr.msra.gmra.mrb[24].mxu1 %vm265_vm0, %v4610_v49 }
 0x15d   : > { %4112 = vmatpush3.bf16.msra.mxu1 %v4111_v23  ;;  %v3937_v24 = vpop.f32.mrb[28].mxu0  ;;  %3928 = vmatprep.mubr.msk.f32.mxu1 %vm4319_vm1, %v4320_v44 }
 0x15e   : > { %v2522_v25 = vpop.f32.mrb[29].mxu0  ;;  %4117 = vmatprep.subr.bf16.mxu1 %v4318_v43 }
 0x15f   : > { %v4118_v26 = vpack.c.bf16 %v3937_v24, %v2522_v25 }
 0x160   : > { %3929 = vmatmul.mubr.msk.f32.vlgmr.msra.gmra.mrb[26].mxu1 %vm265_vm0, %v4610_v49 }
 0x161   : > { %4119 = vmatpush3.bf16.msra.mxu1 %v4118_v26  ;;  %v3951_v27 = vpop.f32.mrb[30].mxu0  ;;  %3942 = vmatprep.mubr.msk.f32.mxu1 %vm4319_vm1, %v4320_v44 }
 0x162   : > { %v2698_v28 = vpop.f32.mrb[31].mxu0  ;;  %4124 = vmatprep.subr.bf16.mxu1 %v4318_v43 }
 0x163   : > { %v4125_v29 = vpack.c.bf16 %v3951_v27, %v2698_v28 }
 0x164   : > { %3943 = vmatmul.mubr.msk.f32.vlgmr.msra.gmra.mrb[28].mxu1 %vm265_vm0, %v4610_v49 }
 0x165   : > { %4126 = vmatpush3.bf16.msra.mxu1 %v4125_v29  ;;  %v3965_v30 = vpop.f32.mrb[32].mxu0  ;;  %3956 = vmatprep.mubr.msk.f32.mxu1 %vm4319_vm1, %v4320_v44 }
 0x166   : > { %v2849_v31 = vpop.f32.mrb[33].mxu0  ;;  %4131 = vmatprep.subr.bf16.mxu1 %v4318_v43 }
 0x167   : > { %v4132_v32 = vpack.c.bf16 %v3965_v30, %v2849_v31 }
 0x168   : > { %3957 = vmatmul.mubr.msk.f32.vlgmr.msra.gmra.mrb[30].mxu1 %vm265_vm0, %v4610_v49 }
 0x169   : > { %4133 = vmatpush3.bf16.msra.mxu1 %v4132_v32  ;;  %v3979_v33 = vpop.f32.mrb[34].mxu0  ;;  %3970 = vmatprep.mubr.msk.f32.mxu1 %vm4319_vm1, %v4320_v44 }
 0x16a   : > { %v3002_v34 = vpop.f32.mrb[35].mxu0  ;;  %4138 = vmatprep.subr.bf16.mxu1 %v4318_v43 }
 0x16b   : > { %v4139_v35 = vpack.c.bf16 %v3979_v33, %v3002_v34 }
 0x16c   : > { %3971 = vmatmul.mubr.msk.f32.vlgmr.msra.gmra.mrb[32].mxu1 %vm265_vm0, %v4610_v49 }
 0x16d   : > { %4140 = vmatpush3.bf16.msra.mxu1 %v4139_v35  ;;  %v3993_v36 = vpop.f32.mrb[36].mxu0  ;;  %3984 = vmatprep.mubr.msk.f32.mxu1 %vm4319_vm1, %v4320_v44 }
 0x16e   : > { %v3155_v37 = vpop.f32.mrb[37].mxu0  ;;  %4145 = vmatprep.subr.bf16.mxu1 %v4318_v43 }
 0x16f   : > { %v4146_v38 = vpack.c.bf16 %v3993_v36, %v3155_v37 }
 0x170   : > { %3985 = vmatmul.mubr.msk.f32.vlgmr.msra.gmra.mrb[34].mxu1 %vm265_vm0, %v4610_v49 }
 0x171   : > { %4147 = vmatpush3.bf16.msra.mxu1 %v4146_v38  ;;  %v4007_v39 = vpop.f32.mrb[38].mxu0  ;;  %3998 = vmatprep.mubr.msk.f32.mxu1 %vm4319_vm1, %v4320_v44 }
 0x172   : > { %v3308_v40 = vpop.f32.mrb[39].mxu0  ;;  %4152 = vmatprep.subr.bf16.mxu1 %v4318_v43 }
 0x173   : > { %v4153_v41 = vpack.c.bf16 %v4007_v39, %v3308_v40 }
 0x174   : > { %3999 = vmatmul.mubr.msk.f32.vlgmr.msra.gmra.mrb[36].mxu1 %vm265_vm0, %v4610_v49 }
 0x175   : > { %4154 = vmatpush3.bf16.msra.mxu1 %v4153_v41  ;;  %4012 = vmatprep.mubr.msk.f32.mxu1 %vm4319_vm1, %v4320_v44 }
 0x178   : > { %4013 = vmatmul.mubr.msk.f32.vlgmr.msra.gmra.mrb[38].mxu1 %vm265_vm0, %v4610_v49 }
 0x1ff   : > { %v416_v42 = vpop.f32.mrb[0].mxu1 }
 0x200   : > { %v3748_v45 = vpop.f32.mrb[1].mxu1  ;;  %v1030_v47 = vmul.f32 %v416_v42, %v416_v42 }
 0x203   : > { %v567_v46 = vpop.f32.mrb[2].mxu1 }
 0x204   : > { %v1031_v48 = vmul.f32 %v567_v46, %v567_v46  ;;  %v1032_v50 = vmul.f32 %v567_v46, %v416_v42  ;;  %v3762_v51 = vpop.f32.mrb[3].mxu1 }
 0x206   : > { %v1041_v52 = vadd.f32 %v1031_v48, %v1030_v47  ;;  %v1036_v44 = vmul.f32 2.0, %v1032_v50 }
 0x207   : > { %v720_v43 = vpop.f32.mrb[4].mxu1 }
 0x208   : > { %v1033_v53 = vsub.f32 %v720_v43, %v1030_v47  ;;  %v3776_v54 = vpop.f32.mrb[5].mxu1  ;;  %v1042_v60 = vadd.f32 0.0001, %v1041_v52  ;;  %v1037_v2 = vadd.f32 0.0001, %v1036_v44 }
 0x20b   : > { %v873_v55 = vpop.f32.mrb[6].mxu1 }
 0x20c   : > { %v1034_v56 = vsub.f32 %v873_v55, %v1031_v48  ;;  %v3790_v57 = vpop.f32.mrb[7].mxu1 }
 0x20e   : > { %v1043_v58 = vadd.f32 %v1034_v56, %v1033_v53 }
 0x20f   : > { %v1026_v59 = vpop.f32.mrb[8].mxu1 }
 0x210   : > { %v1044_v61 = vadd.f32 0.0009, %v1043_v58  ;;  %v1035_v49 = vsub.f32 %v1026_v59, %v1032_v50  ;;  %v3804_v62 = vpop.f32.mrb[9].mxu1 }
 0x212   : > { %v1045_v63 = vmul.f32 %v1044_v61, %v1042_v60  ;;  %v1038_v0 = vmul.f32 2.0, %v1035_v49 }
 0x213   : > { %v1201_v1 = vpop.f32.mrb[10].mxu1 }
 0x214   : > { %4206 = vrcp.f32 %v1045_v63  ;;  %v1039_v3 = vadd.f32 0.0009, %v1038_v0  ;;  %v3818_v4 = vpop.f32.mrb[11].mxu1  ;;  %v1815_v7 = vmul.f32 %v1201_v1, %v1201_v1 }
 0x216   : > { %v1040_v5 = vmul.f32 %v1039_v3, %v1037_v2 }
 0x217   : > { %v1352_v6 = vpop.f32.mrb[12].mxu1 }
 0x218   : > { %v1816_v8 = vmul.f32 %v1352_v6, %v1352_v6  ;;  %v1817_v9 = vmul.f32 %v1352_v6, %v1201_v1  ;;  %v3832_v10 = vpop.f32.mrb[13].mxu1 }
 0x21a   : > { %v1826_v11 = vadd.f32 %v1816_v8, %v1815_v7  ;;  %v1821_v22 = vmul.f32 2.0, %v1817_v9 }
 0x21b   : > { %v1505_v12 = vpop.f32.mrb[14].mxu1 }
 0x21c   : > { %v1818_v13 = vsub.f32 %v1505_v12, %v1815_v7  ;;  %v3846_v14 = vpop.f32.mrb[15].mxu1  ;;  %v1827_v23 = vadd.f32 0.0001, %v1826_v11  ;;  %v1822_v30 = vadd.f32 0.0001, %v1821_v22 }
 0x21e   : > { %v4207_v15 = vpop.eup %4206 }
 0x21f   : > { %v1047_v16 = vmul.f32 %v4207_v15, %v1040_v5  ;;  %v1658_v17 = vpop.f32.mrb[16].mxu1 }
 0x220   : > { %v1819_v18 = vsub.f32 %v1658_v17, %v1816_v8  ;;  %v3860_v19 = vpop.f32.mrb[17].mxu1 }
 0x222   : > { %v1828_v20 = vadd.f32 %v1819_v18, %v1818_v13 }
 0x223   : > { %v1811_v21 = vpop.f32.mrb[18].mxu1 }
 0x224   : > { %v1829_v24 = vadd.f32 0.0009, %v1828_v20  ;;  %v1820_v25 = vsub.f32 %v1811_v21, %v1817_v9  ;;  %v3874_v26 = vpop.f32.mrb[19].mxu1 }
 0x226   : > { %v1830_v27 = vmul.f32 %v1829_v24, %v1827_v23  ;;  %v1823_v28 = vmul.f32 2.0, %v1820_v25 }
 0x227   : > { %v1987_v29 = vpop.f32.mrb[20].mxu1 }
 0x228   : > { %4208 = vrcp.f32 %v1830_v27  ;;  %v1824_v31 = vadd.f32 0.0009, %v1823_v28  ;;  %v3888_v32 = vpop.f32.mrb[21].mxu1  ;;  %v2601_v35 = vmul.f32 %v1987_v29, %v1987_v29 }
 0x22a   : > { %v1825_v33 = vmul.f32 %v1824_v31, %v1822_v30 }
 0x22b   : > { %v2138_v34 = vpop.f32.mrb[22].mxu1 }
 0x22c   : > { %v2602_v36 = vmul.f32 %v2138_v34, %v2138_v34  ;;  %v2603_v37 = vmul.f32 %v2138_v34, %v1987_v29  ;;  %v3902_v38 = vpop.f32.mrb[23].mxu1 }
 0x22e   : > { %v2612_v39 = vadd.f32 %v2602_v36, %v2601_v35  ;;  %v2607_v53 = vmul.f32 2.0, %v2603_v37 }
 0x22f   : > { %v2291_v40 = vpop.f32.mrb[24].mxu1 }
 0x230   : > { %v2604_v41 = vsub.f32 %v2291_v40, %v2601_v35  ;;  %v3916_v42 = vpop.f32.mrb[25].mxu1  ;;  %v2613_v54 = vadd.f32 0.0001, %v2612_v39  ;;  %v2608_v60 = vadd.f32 0.0001, %v2607_v53 }
 0x232   : > { %v4209_v45 = vpop.eup %4208 }
 0x233   : > { %v1832_v46 = vmul.f32 %v4209_v45, %v1825_v33  ;;  %v2444_v47 = vpop.f32.mrb[26].mxu1 }
 0x234   : > { %v2605_v48 = vsub.f32 %v2444_v47, %v2602_v36  ;;  %v3930_v50 = vpop.f32.mrb[27].mxu1 }
 0x235   : > { %v1833_v51 = vadd.f32 %v1832_v46, %v1047_v16 }
 0x236   : > { %v2614_v52 = vadd.f32 %v2605_v48, %v2604_v41 }
 0x237   : > { %v2597_v43 = vpop.f32.mrb[28].mxu1 }
 0x238   : > { %v2615_v55 = vadd.f32 0.0009, %v2614_v52  ;;  %v2606_v56 = vsub.f32 %v2597_v43, %v2603_v37  ;;  %v3944_v57 = vpop.f32.mrb[29].mxu1 }
 0x23a   : > { %v2616_v58 = vmul.f32 %v2615_v55, %v2613_v54  ;;  %v2609_v59 = vmul.f32 2.0, %v2606_v56 }
 0x23b   : > { %v2773_v44 = vpop.f32.mrb[30].mxu1 }
 0x23c   : > { %4210 = vrcp.f32 %v2616_v58  ;;  %v2610_v61 = vadd.f32 0.0009, %v2609_v59  ;;  %v3958_v49 = vpop.f32.mrb[31].mxu1  ;;  %v3387_v0 = vmul.f32 %v2773_v44, %v2773_v44 }
 0x23e   : > { %v2611_v62 = vmul.f32 %v2610_v61, %v2608_v60 }
 0x23f   : > { %v2924_v63 = vpop.f32.mrb[32].mxu1 }
 0x240   : > { %v3388_v1 = vmul.f32 %v2924_v63, %v2924_v63  ;;  %v3389_v2 = vmul.f32 %v2924_v63, %v2773_v44  ;;  %v3972_v3 = vpop.f32.mrb[33].mxu1 }
 0x242   : > { %v3398_v4 = vadd.f32 %v3388_v1, %v3387_v0  ;;  %v3393_v16 = vmul.f32 2.0, %v3389_v2 }
 0x243   : > { %v3077_v5 = vpop.f32.mrb[34].mxu1 }
 0x244   : > { %v3390_v6 = vsub.f32 %v3077_v5, %v3387_v0  ;;  %v3986_v7 = vpop.f32.mrb[35].mxu1  ;;  %v3399_v17 = vadd.f32 0.0001, %v3398_v4  ;;  %v3394_v23 = vadd.f32 0.0001, %v3393_v16 }
 0x246   : > { %v4211_v8 = vpop.eup %4210 }
 0x247   : > { %v2618_v9 = vmul.f32 %v4211_v8, %v2611_v62  ;;  %v3230_v10 = vpop.f32.mrb[36].mxu1 }
 0x248   : > { %v3391_v11 = vsub.f32 %v3230_v10, %v3388_v1  ;;  %v4000_v12 = vpop.f32.mrb[37].mxu1 }
 0x249   : > { %v2619_v13 = vadd.f32 %v2618_v9, %v1833_v51 }
 0x24a   : > { %v3400_v14 = vadd.f32 %v3391_v11, %v3390_v6 }
 0x24b   : > { %v3383_v15 = vpop.f32.mrb[38].mxu1 }
 0x24c   : > { %v3401_v18 = vadd.f32 0.0009, %v3400_v14  ;;  %v3392_v19 = vsub.f32 %v3383_v15, %v3389_v2  ;;  %v4014_v20 = vpop.f32.mrb[39].mxu1 }
 0x24e   : > { %v3402_v21 = vmul.f32 %v3401_v18, %v3399_v17  ;;  %v3395_v22 = vmul.f32 2.0, %v3392_v19 }
 0x250   : > { %4212 = vrcp.f32 %v3402_v21  ;;  %v3396_v24 = vadd.f32 0.0009, %v3395_v22 }
 0x252   : > { %v3397_v25 = vmul.f32 %v3396_v24, %v3394_v23 }
 0x25a   : > { %v4213_v26 = vpop.eup %4212 }
 0x25b   : > { %v3404_v27 = vmul.f32 %v4213_v26, %v3397_v25 }
 0x25d   : > { %v3405_v28 = vadd.f32 %v3404_v27, %v2619_v13 }
 0x25f   : > { %v3407_v29 = vsel %vm3406_vm2, %v3405_v28, 0.0 }
 0x260   : > { %3408 = vadd.xlane.f32.xlu0 %v3407_v29 }
 0x2ed   : > { %v3409_v30 = vpop.xlane.xlu0 %3408 }
 0x2ee   : > { %v3410_v31 = vrot.slane %v3409_v30, 4 }
 0x2f0   : > { %v3411_v32 = vadd.f32 %v3410_v31, %v3409_v30 }
 0x2f2   : > { %v3412_v33 = vrot.slane %v3411_v32, 2 }
 0x2f4   : > { %v3413_v34 = vadd.f32 %v3412_v33, %v3411_v32 }
 0x2f6   : > { %v3414_v35 = vrot.slane %v3413_v34, 1 }
 0x2f8   : > { %v3415_v36 = vadd.f32 %v3414_v35, %v3413_v34 }
 0x2fa   : > { %4155 = vpush %v3415_v36 }
 0x32b   : > { %s4156_s30 = spop %4155 }
 0x32c   : > { %v3417_v37 = vstv %s4156_s30 }
 0x32d   : > { %v3418_v38 = vmul.f32 0.027777778, %v3417_v37 }
 0x32f   : > { %3420 = vst.msk [vmem:[%s257_s15] sm:$0x1] %vm3419_vm3, %v3418_v38 }
 0x330 PF: > { %p17_p11 = scmp.ge.s32.totalorder %s4368_s20, 4   ;;  %s4738_s15 = smov %s4304_s16 }
 0x331   : > { %s4739_s16 = smov %s4308_s17  ;;  %s4740_s17 = smov %s4378_s23 }
 0x332   : > { %s4741_s18 = smov %s4368_s20  ;;  %19 = sbr.rel (!%p17_p11) target bundleno = 5 (0x5), region = 95 }
 0x339   :  { %3438 = vsyncpa [#allocation3], 1 }
 0x33a   :  { %3440 = vsyncpa [#allocation3 + $0x1], 1 }
 0x33b   :  { %3441 = vsyncpa [#allocation5], 1 }
 0x33c   :  { %3443 = vsyncpa [#allocation5 + $0x1], 1 }

</bundles_post_ra>
